<compile_context>
chip_gen: v7x
topology: tpu7x:2x2x1
jax: 0.10.0
libtpu: 0.0.40
codegen_flags: <defaults>
</compile_context>

<pallas_src>
import functools

import jax
import jax.numpy as jnp
from jax.experimental import pallas as pl
from jax.experimental.pallas import tpu as pltpu


def _round_up(x: int, m: int) -> int:
    return ((x + m - 1) // m) * m


def _gather_rows(ids_ref, table_hbm, rows_vmem, sems):
    """Gather TOK_TILE rows of the HBM table into a VMEM (TOK_TILE, D) slab.

    ids_ref:   (B, S_pad) int32 in SMEM (scalar prefetch)
    table_hbm: (V, D) raw HBM ref (memory_space=pl.ANY)
    rows_vmem: (TOK_TILE, D) VMEM scratch
    sems:      (TOK_TILE,) DMA semaphores
    """
    b = pl.program_id(0)
    t = pl.program_id(1)
    tok_tile = rows_vmem.shape[0]

    # Issue every row DMA first so they are all in flight simultaneously.
    @pl.loop(0, tok_tile)
    def _issue(r):
        token = ids_ref[b, t * tok_tile + r]
        pltpu.make_async_copy(
            table_hbm.at[pl.ds(token, 1)],
            rows_vmem.at[pl.ds(r, 1)],
            sems.at[r],
        ).start()

    # Then wait on all of them.
    @pl.loop(0, tok_tile)
    def _wait(r):
        pltpu.make_async_copy(
            table_hbm.at[pl.ds(0, 1)],        # shape-only; wait is on sems[r]
            rows_vmem.at[pl.ds(r, 1)],
            sems.at[r],
        ).wait()


def _embedder_pos_kernel(ids_ref, table_hbm, pos_ref, out_ref, rows_vmem, sems):
    """out[b, t-tile, :] = gather(table, ids) + pos[t-tile, :]."""
    _gather_rows(ids_ref, table_hbm, rows_vmem, sems)
    out_ref[0] = (rows_vmem[...] + pos_ref[...]).astype(out_ref.dtype)


def _embedder_nopos_kernel(ids_ref, table_hbm, out_ref, rows_vmem, sems):
    """out[b, t-tile, :] = gather(table, ids)  (no positional add)."""
    _gather_rows(ids_ref, table_hbm, rows_vmem, sems)
    out_ref[0] = rows_vmem[...].astype(out_ref.dtype)


@functools.partial(jax.jit, static_argnames=("use_positional", "tok_tile"))
def embedder_forward(ids, emb_table, pos_table=None, use_positional=True, tok_tile=128):
    """JAX wrapper mirroring Embedder.forward.

    ids:        (B, S) int32 token ids
    emb_table:  (V, D) float32  -- nn.Embedding weight
    pos_table:  (1, max_length, D) float32 -- PositionalEmbedding parameter
                (may be None when use_positional=False)
    returns     (B, S, D) float32
    """
    B, S = ids.shape
    V, D = emb_table.shape

    # Clamp like jnp.take / XLA gather on TPU; also keeps the row DMAs in bounds.
    ids = jnp.clip(ids.astype(jnp.int32), 0, V - 1)

    # Token tile: multiple of 8 (sublane granularity), capped by the padded seq len.
    tok_tile = int(min(tok_tile, _round_up(S, 8)))
    s_pad = _round_up(S, tok_tile)
    if s_pad != S:
        ids = jnp.pad(ids, ((0, 0), (0, s_pad - S)))  # pad with (valid) token 0

    grid = (B, s_pad // tok_tile)
    out_shape = jax.ShapeDtypeStruct((B, s_pad, D), emb_table.dtype)
    scratch_shapes = [
        pltpu.VMEM((tok_tile, D), emb_table.dtype),   # gathered rows
        pltpu.SemaphoreType.DMA((tok_tile,)),         # one sem per in-flight row DMA
    ]
    table_spec = pl.BlockSpec(memory_space=pl.ANY)    # stay in HBM; manual DMA gather
    out_spec = pl.BlockSpec((1, tok_tile, D), lambda b, t, ids_sref: (b, t, 0))
    cparams = pltpu.CompilerParams(
        dimension_semantics=("parallel", "parallel"),  # independent tiles -> 2 TCs on v7x
    )

    if use_positional:
        pos = pos_table[0, :S, :].astype(emb_table.dtype)   # [:, :x.size(1), :] slice (glue)
        if s_pad != S:
            pos = jnp.pad(pos, ((0, s_pad - S), (0, 0)))
        out = pl.pallas_call(
            _embedder_pos_kernel,
            out_shape=out_shape,
            grid_spec=pltpu.PrefetchScalarGridSpec(
                num_scalar_prefetch=1,                # ids -> SMEM, drives the gather
                grid=grid,
                in_specs=[
                    table_spec,
                    pl.BlockSpec((tok_tile, D), lambda b, t, ids_sref: (t, 0)),
                ],
                out_specs=out_spec,
                scratch_shapes=scratch_shapes,
            ),
            compiler_params=cparams,
        )(ids, emb_table, pos)
    else:
        # Separate variant: no positional DMA, no dead add.
        out = pl.pallas_call(
            _embedder_nopos_kernel,
            out_shape=out_shape,
            grid_spec=pltpu.PrefetchScalarGridSpec(
                num_scalar_prefetch=1,
                grid=grid,
                in_specs=[table_spec],
                out_specs=out_spec,
                scratch_shapes=scratch_shapes,
            ),
            compiler_params=cparams,
        )(ids, emb_table)

    if s_pad != S:
        out = out[:, :S, :]
    return out


def reference_forward(ids, emb_table, pos_table=None, use_positional=True):
    tok = jnp.take(emb_table, ids, axis=0)             # (B, S, D)
    if use_positional:
        S = ids.shape[1]
        return tok + pos_table[:, :S, :]
    return tok


if __name__ == "__main__":
    # Small, deterministic synthetic config (D multiple of 128 -> lane-dense stores).
    B, S = 2, 8
    vocab_size = 256
    embedding_dim = 128
    max_length = 16

    key = jax.random.PRNGKey(0)
    k_ids, k_emb, k_pos = jax.random.split(key, 3)

    ids = jax.random.randint(k_ids, (B, S), 0, vocab_size, dtype=jnp.int32)
    emb_table = jax.random.normal(k_emb, (vocab_size, embedding_dim), dtype=jnp.float32)
    # Positional parameter is zeros at torch init; use small random values so the
    # add path is actually exercised.
    pos_table = 0.02 * jax.random.normal(
        k_pos, (1, max_length, embedding_dim), dtype=jnp.float32)

    # Positional path.
    out = embedder_forward(ids, emb_table, pos_table, use_positional=True)
    out = jax.block_until_ready(out)
    ref = reference_forward(ids, emb_table, pos_table, use_positional=True)
    assert out.shape == (B, S, embedding_dim), out.shape
    assert out.dtype == jnp.float32
    assert jnp.allclose(out, ref, atol=1e-6, rtol=1e-6), "positional path mismatch"

    # No-positional path (separate kernel variant, no zero add / zero DMA).
    out_np = embedder_forward(ids, emb_table, None, use_positional=False)
    out_np = jax.block_until_ready(out_np)
    ref_np = reference_forward(ids, emb_table, None, use_positional=False)
    assert jnp.allclose(out_np, ref_np, atol=1e-6, rtol=1e-6), "no-positional path mismatch"

    print("KERNEL_OK")
</pallas_src>

<mosaic_0001>
module attributes {stable_mosaic.version = 11 : i64} {
  func.func @_embedder_pos_kernel(%arg0: i32, %arg1: i32, %arg2: memref<2x8xi32, #tpu.memory_space<smem>>, %arg3: memref<256x128xf32, #tpu.memory_space<any>>, %arg4: memref<8x128xf32, #tpu.memory_space<vmem>>, %arg5: memref<1x8x128xf32, #tpu.memory_space<vmem>>, %arg6: memref<8x128xf32, #tpu.memory_space<vmem>>, %arg7: memref<8x!tpu.dma_semaphore, #tpu.memory_space<semaphore_mem>>) attributes {dimension_semantics = [#tpu.dimension_semantics<parallel>, #tpu.dimension_semantics<parallel>], iteration_bounds = array<i64: 2, 1>, scalar_prefetch = 1 : i64, scratch_operands = 2 : i64, tpu.core_type = #tpu.core_type<tc>, window_params = [{}, {transform_indices = @transform_1, window_bounds = array<i64: 8, 128>}, {transform_indices = @transform_2, window_bounds = array<i64: 1, 8, 128>}]} {
    %c0_i32 = arith.constant 0 : i32
    %c8_i32 = arith.constant 8 : i32
    %0 = arith.addi %c0_i32, %c8_i32 : i32
    %c1_i32 = arith.constant 1 : i32
    scf.for %arg8 = %c0_i32 to %0 step %c1_i32  : i32 {
      %c1_i32_11 = arith.constant 1 : i32
      %8 = arith.muli %arg8, %c1_i32_11 : i32
      %c0_i32_12 = arith.constant 0 : i32
      %9 = arith.addi %c0_i32_12, %8 : i32
      %c8_i32_13 = arith.constant 8 : i32
      %10 = arith.muli %arg1, %c8_i32_13 : i32
      %11 = arith.addi %10, %9 : i32
      %12 = arith.index_cast %arg0 : i32 to index
      %13 = arith.index_cast %11 : i32 to index
      %14 = memref.load %arg2[%12, %13] : memref<2x8xi32, #tpu.memory_space<smem>>
      %c0_i32_14 = arith.constant 0 : i32
      %15 = tpu.memref_slice %arg3[%14, %c0_i32_14] : memref<256x128xf32, #tpu.memory_space<any>> -> memref<1x128xf32, #tpu.memory_space<any>>
      %c0_i32_15 = arith.constant 0 : i32
      %16 = tpu.memref_slice %arg6[%9, %c0_i32_15] : memref<8x128xf32, #tpu.memory_space<vmem>> -> memref<1x128xf32, #tpu.memory_space<vmem>>
      %17 = tpu.memref_slice %arg7[%9] : memref<8x!tpu.dma_semaphore, #tpu.memory_space<semaphore_mem>> -> memref<1x!tpu.dma_semaphore, #tpu.memory_space<semaphore_mem>>
      %18 = tpu.memref_squeeze %17 : memref<1x!tpu.dma_semaphore, #tpu.memory_space<semaphore_mem>> -> memref<!tpu.dma_semaphore, #tpu.memory_space<semaphore_mem>>
      tpu.enqueue_dma source(%15 : memref<1x128xf32, #tpu.memory_space<any>>) target(%16 : memref<1x128xf32, #tpu.memory_space<vmem>>) target_semaphore(%18 : memref<!tpu.dma_semaphore, #tpu.memory_space<semaphore_mem>>)
    }
    %c8_i32_0 = arith.constant 8 : i32
    %c0_i32_1 = arith.constant 0 : i32
    %c8_i32_2 = arith.constant 8 : i32
    %1 = arith.addi %c0_i32_1, %c8_i32_2 : i32
    %c1_i32_3 = arith.constant 1 : i32
    scf.for %arg8 = %c0_i32_1 to %1 step %c1_i32_3  : i32 {
      %c1_i32_11 = arith.constant 1 : i32
      %8 = arith.muli %arg8, %c1_i32_11 : i32
      %c0_i32_12 = arith.constant 0 : i32
      %9 = arith.addi %c0_i32_12, %8 : i32
      %c0_i32_13 = arith.constant 0 : i32
      %c0_i32_14 = arith.constant 0 : i32
      %10 = tpu.memref_slice %arg3[%c0_i32_13, %c0_i32_14] : memref<256x128xf32, #tpu.memory_space<any>> -> memref<1x128xf32, #tpu.memory_space<any>>
      %c0_i32_15 = arith.constant 0 : i32
      %11 = tpu.memref_slice %arg6[%9, %c0_i32_15] : memref<8x128xf32, #tpu.memory_space<vmem>> -> memref<1x128xf32, #tpu.memory_space<vmem>>
      %12 = tpu.memref_slice %arg7[%9] : memref<8x!tpu.dma_semaphore, #tpu.memory_space<semaphore_mem>> -> memref<1x!tpu.dma_semaphore, #tpu.memory_space<semaphore_mem>>
      %13 = tpu.memref_squeeze %12 : memref<1x!tpu.dma_semaphore, #tpu.memory_space<semaphore_mem>> -> memref<!tpu.dma_semaphore, #tpu.memory_space<semaphore_mem>>
      tpu.wait_dma2 semaphore(%13 : memref<!tpu.dma_semaphore, #tpu.memory_space<semaphore_mem>>) src(%10 : memref<1x128xf32, #tpu.memory_space<any>>) dst(%11 : memref<1x128xf32, #tpu.memory_space<vmem>>)
    }
    %c8_i32_4 = arith.constant 8 : i32
    %c0 = arith.constant 0 : index
    %c0_5 = arith.constant 0 : index
    %2 = vector.load %arg6[%c0, %c0_5] : memref<8x128xf32, #tpu.memory_space<vmem>>, vector<8x128xf32>
    %c0_6 = arith.constant 0 : index
    %c0_7 = arith.constant 0 : index
    %3 = vector.load %arg4[%c0_6, %c0_7] : memref<8x128xf32, #tpu.memory_space<vmem>>, vector<8x128xf32>
    %4 = arith.addf %2, %3 : vector<8x128xf32>
    %c0_8 = arith.constant 0 : index
    %c0_9 = arith.constant 0 : index
    %c0_10 = arith.constant 0 : index
    %5 = vector.load %arg5[%c0_8, %c0_9, %c0_10] : memref<1x8x128xf32, #tpu.memory_space<vmem>>, vector<1x8x128xf32>
    %6 = vector.shape_cast %5 : vector<1x8x128xf32> to vector<8x128xf32>
    %7 = vector.shape_cast %4 : vector<8x128xf32> to vector<1x8x128xf32>
    tpu.vector_store %arg5[%c0_8, %c0_9, %c0_10], %7 {strides = array<i32>} : memref<1x8x128xf32, #tpu.memory_space<vmem>>, vector<1x8x128xf32>,
    return
  }
  func.func @transform_1(%arg0: i32, %arg1: i32, %arg2: memref<2x8xi32, #tpu.memory_space<smem>>) -> (i32, i32) {
    %c0_i32 = arith.constant 0 : i32
    %c0_i32_0 = arith.constant 0 : i32
    return %arg1, %c0_i32 : i32, i32
  }
  func.func @transform_2(%arg0: i32, %arg1: i32, %arg2: memref<2x8xi32, #tpu.memory_space<smem>>) -> (i32, i32, i32) {
    %c0_i32 = arith.constant 0 : i32
    %c0_i32_0 = arith.constant 0 : i32
    return %arg0, %arg1, %c0_i32 : i32, i32, i32
  }
}

</mosaic_0001>

<bundles_post_ra>
// kernel: embedder_forward.1
= control target key start
LH: loop header
LB: loop body
LE: loop exit
PB: predicated region body
PF: predicated region fallthrough
CT: control target
= control target key end

     0   :  { %s732_s0 = inlined_call_operand.vmem [shape: s32[2,8], index: 0, kind: input, shape index: {}]   ;;  %s733_s1 = inlined_call_operand.hbm [shape: f32[256,128], index: 1, kind: input, shape index: {}]   ;;  %s734_s2 = inlined_call_operand.vmem [shape: f32[8,128], index: 2, kind: input, shape index: {}]   ;;  %s735_s3 = inlined_call_operand.hbm [shape: f32[2,8,128], index: 3, kind: output, shape index: {}]  }
   0x1   :  { %s8_s14 = sshll.u32 %s732_s0, 4  ;;  %s9_s14 = int_to_ptr.vmem [resolvable:$true] %s8_s14 }
   0x2   :  { %s427_s15 = scalar_lea.vmem %s9_s14, 32  ;;  %p432_p1 = scmp.lt.s32.totalorder %s9_s14, %s9_s14 }
   0x3   :  { %p428_p0 = scmp.ne.s32.totalorder %s9_s14, %s427_s15  ;;  %p433_p2 = scmp.lt.s32.totalorder %s427_s15, %s427_s15 }
   0x5   :  { %p434_p3 = por %p433_p2, %p432_p1 }
   0x7   :  { %p435_p4 = pnand %p434_p3, %p428_p0 }
   0x9   :  { %438 = shalt.err (!%p435_p4)  }
   0xa   :  { %s563_s16 = smov [#allocation5]  }
   0xb   :  { %11 = dma.vmem_to_smem %s9_s14, 32, %s563_s16, [#allocation4] }
   0xc   :  { %523 = dma.done.wait [#allocation4], 32 }
   0xd   :  { %524 = vsyncadd [#allocation4], 4294967264 }
   0xe   :  { %13 = sfence }
   0xf   :  { %14 = vsyncpa [#allocation7], 0 }
  0x10   :  { %16 = vsyncpa [#allocation7 + $0x1], 0  ;;  %s589_s17 = smov 0   ;;  %s591_s18 = smov 0  }
  0x11   :  { %s593_s0 = smov 0   ;;  %s595_s19 = smov 0  }
  0x12   :  { %s597_s20 = smov 0   ;;  %s599_s21 = smov 0  }
  0x13 LB: > { %739 = sst [smem:[#allocation15_spill]] %s549_s20  ;;  %s335_s22 = sadd.s32 4294967295, %s553_s21   ;;  %s553_s21 = sphi %s599_s21, %s22_s21   ;;  %s549_s20 = sphi %s597_s20, %s748_s20   ;;  %s545_s19 = sphi %s595_s19, %s747_s19   ;;  %s541_s0 = sphi %s593_s0, %s751_s0   ;;  %s537_s18 = sphi %s591_s18, %s750_s18   ;;  %s533_s17 = sphi %s589_s17, %s749_s17  }
  0x14   : > { %s336_s23 = sadd.s32 4294967294, %s553_s21   ;;  %s34_s24 = sadd.s32 1, %s549_s20 }
  0x15   : > { %s69_s25 = sadd.s32 1, %s541_s0  ;;  %p36_p5 = scmp.ge.s32.totalorder %s34_s24, 2 }
  0x16   : > { %p79_p6 = scmp.ne.s32.totalorder %s541_s0, %s537_s18  ;;  %p80_p7 = scmp.eq.s32.totalorder %s335_s22, 1 }
  0x17   : > { %p85_p8 = scmp.ne.s32.totalorder %s537_s18, %s533_s17  ;;  %s753_s24 = smov (%p36_p5, %s34_s24), 0 }
  0x18   : > { %740 = sst [smem:[#allocation16_spill]] %s753_s24  ;;  %p629_p9 = por %p80_p7, %p79_p6 }
  0x19   : > { %p86_p10 = scmp.eq.s32.totalorder %s336_s23, 1  ;;  %s64_s27 = ssub.s32 %s549_s20, %s753_s24 }
  0x1a   : > { %p339_p11 = scmp.ge.s32.totalorder %s553_s21, 1  ;;  %p67_p12 = scmp.eq.s32.totalorder %s64_s27, 0 }
  0x1b   : > { %p636_p13 = por %p86_p10, %p85_p8  ;;  %p111_p0 = scmp.lt.s32.totalorder %s553_s21, 3 }
  0x1c   : > { %s642_s29 = scalar_select %p67_p12, %s541_s0, %s69_s25  }
  0x1d   : > { %s742_s28 = scalar_select %p636_p13, 1, 0 }
  0x1e   : > { %p112_p1 = pnand %p339_p11, %p111_p0 }
  0x1f   : > { %s736_s30 = sand.u32 (!%p112_p1), 1, %s537_s18   ;;  %s650_s6 = smov (!%p112_p1), 0  }
  0x20   : > { %115 = sbr.rel (%p112_p1) target bundleno = 113 (0x71), region = 24  ;;  %s647_s4 = sshll.u32 (!%p112_p1), %s736_s30, 3 }
  0x27 LB: >> { %s142_s7 = sshra.s32 %s557_s6, 7  ;;  %s147_s8 = sand.u32 127, %s557_s6  ;;  %s557_s6 = sphi %s650_s6, %s139_s6  }
  0x28   : >> { %s144_s9 = sadd.s32 %s545_s19, %s142_s7  ;;  %s152_s13 = scalar_lea.vmem [#allocation2], %s557_s6 }
  0x29   : >> { %s341_s10 = sshll.u32 %s144_s9, 7  ;;  %s161_s14 = sshll.u32 %s152_s13, 4  ;;  %s162_s14 = int_to_ptr.vmem [resolvable:$true] %s161_s14 }
  0x2a   : >> { %s148_s11 = sadd.s32 %s341_s10, %s147_s8  ;;  %s153_s25 = scalar_lea.sflag [#allocation3], %s557_s6 }
  0x2b   : >> { %s149_s12 = sld [smem:[#allocation5 + %s148_s11]]  ;;  %s441_s24 = scalar_lea.hbm %s733_s1, 4096 }
  0x31   : >> { %s342_s15 = sshll.u32 %s149_s12, 4 }
  0x32   : >> { %s151_s23 = scalar_lea.hbm %s733_s1, %s342_s15 }
  0x33   : >> { %s439_s27 = scalar_lea.hbm %s151_s23, 16  ;;  %p442_p3 = scmp.lt.u32.totalorder %s151_s23, %s733_s1 }
  0x34   : >> { %p440_p2 = scmp.ne.s32.totalorder %s151_s23, %s439_s27  ;;  %p443_p4 = scmp.lt.u32.totalorder %s441_s24, %s439_s27 }
  0x35   : >> { %p445_p6 = scmp.lt.u32.totalorder %s439_s27, %s151_s23 }
  0x36   : >> { %p444_p5 = por %p443_p4, %p442_p3 }
  0x38   : >> { %p446_p7 = por %p445_p6, %p444_p5 }
  0x3a   : >> { %p447_p8 = pnand %p446_p7, %p440_p2 }
  0x3c   : >> { %450 = shalt.err (!%p447_p8)  }
  0x3d   : >> { %s451_s8 = scalar_lea.vmem %s162_s14, 16  ;;  %s564_s9 = smov [#allocation2]  }
  0x3e   : >> { %p452_p10 = scmp.ne.s32.totalorder %s162_s14, %s451_s8  ;;  %s453_s10 = sshll.u32 %s564_s9, 4  ;;  %s454_s10 = int_to_ptr.vmem [resolvable:$false] %s453_s10 }
  0x3f   : >> { %s455_s11 = scalar_lea.vmem %s454_s10, 128  ;;  %p456_p11 = scmp.lt.s32.totalorder %s162_s14, %s454_s10 }
  0x40   : >> { %p457_p12 = scmp.lt.s32.totalorder %s455_s11, %s451_s8 }
  0x42   : >> { %p458_p0 = por %p457_p12, %p456_p11 }
  0x44   : >> { %p459_p1 = pnand %p458_p0, %p452_p10 }
  0x46   : >> { %462 = shalt.err (!%p459_p1)  }
  0x47   : >> { %164 = dma.hbm_to_vmem [thread:$0]  %s151_s23, 16, %s162_s14, %s153_s25 }
  0x48   : >> { %s139_s6 = sadd.s32 1, %s557_s6  }
  0x49   : >> { %p136_p13 = scmp.ge.s32.totalorder %s139_s6, 8  }
  0x4a   : > { %s559_s20 = smov (%p136_p13), 0  }
  0x4b   : > { %138 = sbr.rel (!%p136_p13) target bundleno = 39 (0x27), region = 88 }
  0x52 LB: >> { %s171_s24 = scalar_lea.sflag [#allocation3], %s561_s20  ;;  %s561_s20 = sphi %s559_s20, %s170_s20  }
  0x53   : >> { %525 = dma.done.wait %s171_s24, 16 }
  0x54   : >> { %526 = vsyncadd %s171_s24, 4294967280  ;;  %s170_s20 = sadd.s32 1, %s561_s20  }
  0x55   : >> { %p167_p2 = scmp.ge.s32.totalorder %s170_s20, 8  }
  0x56   : > { %v175_v0 = vld [vmem:[#allocation2] sm:$0xff] (%p167_p2)  ;;  %s344_s6 = sshll.u32 (%p167_p2), %s545_s19, 7  ;;  %s743_s15 = scalar_lea.vmem (%p167_p2), [#allocation6], %s647_s4 }
  0x57   : > { %169 = sbr.rel (!%p167_p2) target bundleno = 82 (0x52), region = 99  ;;  %v176_v1 = vld [vmem:[%s734_s2] sm:$0xff] (%p167_p2)  ;;  %s679_s14 = scalar_lea.hbm (%p167_p2), %s735_s3, %s344_s6 }
  0x58   : > { %v177_v2 = vadd.f32 (%p167_p2), %v176_v1, %v175_v0  ;;  %s194_s16 = sshll.u32 (%p167_p2), %s743_s15, 4  ;;  %s744_s22 = smov (%p167_p2), %s743_s15  ;;  %s683_s16 = int_to_ptr.vmem [resolvable:$true] %s194_s16 }
  0x59   : > { %s745_s23 = sand.u32 (%p167_p2), 1, %s537_s18   ;;  %s463_s27 = scalar_lea.vmem (%p167_p2), %s683_s16, 128 }
  0x5a   : > { %178 = vst [vmem:[%s744_s22] sm:$0xff] (%p167_p2), %v177_v2  ;;  %s180_s25 = scalar_lea.sflag (%p167_p2), [#allocation7], %s745_s23  ;;  %p464_p13 = scmp.ne.s32.totalorder (%p167_p2), %s683_s16, %s463_s27 }
  0x5b   : > { %s565_s19 = smov (%p167_p2), [#allocation6]  }
  0x5c   : > { %p465_p3 = pnand (%p167_p2), %p464_p13, %p629_p9  ;;  %s467_s7 = sshll.u32 (%p167_p2), %s565_s19, 4  ;;  %s468_s7 = int_to_ptr.vmem [resolvable:$false] %s467_s7 }
  0x5d   : > { %s469_s8 = scalar_lea.vmem (%p167_p2), %s468_s7, 256  ;;  %p470_p5 = scmp.lt.s32.totalorder (%p167_p2), %s683_s16, %s468_s7 }
  0x5e   : > { %p466_p4 = pneg %p465_p3  ;;  %p471_p6 = scmp.lt.s32.totalorder %s469_s8, %s463_s27 }
  0x60   : > { %p472_p7 = por %p471_p6, %p470_p5 }
  0x62   : > { %p473_p8 = pnand %p472_p7, %p466_p4 }
  0x64   : > { %476 = shalt.err (!%p473_p8)
}
  0x65   : > { %s477_s4 = scalar_lea.hbm %s679_s14, 128  ;;  %s481_s11 = scalar_lea.hbm %s735_s3, 256 }
  0x66   : > { %p478_p10 = scmp.ne.s32.totalorder %s679_s14, %s477_s4  ;;  %p482_p0 = scmp.lt.u32.totalorder %s679_s14, %s735_s3 }
  0x67   : > { %p483_p1 = scmp.lt.u32.totalorder %s481_s11, %s477_s4  ;;  %p485_p13 = scmp.lt.u32.totalorder %s477_s4, %s679_s14 }
  0x68   : > { %p479_p11 = pnand %p478_p10, %p629_p9 }
  0x69   : > { %p484_p2 = por %p483_p1, %p482_p0 }
  0x6a   : > { %p480_p12 = pneg %p479_p11 }
  0x6b   : > { %p486_p3 = por %p485_p13, %p484_p2 }
  0x6d   : > { %p487_p4 = pnand %p486_p3, %p480_p12 }
  0x6f   : > { %490 = shalt.err (!%p487_p4)
}
  0x70   : > { %355 = dma.vmem_to_hbm [thread:$0]  (%p629_p9), %s683_s16, 128, %s679_s14, %s180_s25  }
  0x71 PF: > { %p361_p5 = scmp.ge.s32.totalorder %s553_s21, 2  ;;  %s206_s30 = sand.u32 1, %s533_s17  }
  0x72   : > { %p746_p6 = scmp.ne.s32.totalorder %s742_s28, 0  ;;  %s207_s5 = scalar_lea.sflag [#allocation7], %s206_s30 }
  0x74   : > { %p358_p7 = pnand %p361_p5, %p746_p6 }
  0x76   : > { %528 = dma.done.wait (!%p358_p7), %s207_s5, 128  }
  0x77   : > { %530 = vsyncadd (!%p358_p7), %s207_s5, 4294967168  ;;  %s22_s21 = sadd.s32 1, %s553_s21   ;;  %s747_s19 = sld [smem:[#allocation15_spill]] }
  0x78   : > { %p19_p8 = scmp.ge.s32.totalorder %s22_s21, 4   ;;  %s748_s20 = sld [smem:[#allocation16_spill]] }
  0x79   : > { %s749_s17 = smov %s537_s18  ;;  %s750_s18 = smov %s541_s0 }
  0x7a   : > { %s751_s0 = smov %s642_s29  ;;  %21 = sbr.rel (!%p19_p8) target bundleno = 19 (0x13), region = 110 }
  0x81   :  { %212 = vsyncpa [#allocation7], 1 }
  0x82   :  { %214 = vsyncpa [#allocation7 + $0x1], 1 }
  0x83   :  { %215 = vsyncmov [#allocation3] }
  0x86   :  { %s216_s26 = vpop.sfrf %215 }
  0x87   :  { %p347_p9 = scmp.ne.s32.totalorder %s216_s26, 0 }
  0x89   :  { %220 = shalt.err (%p347_p9)  }
  0x8a   :  { %222 = vsyncmov [#allocation3 + $0x1] }
  0x8d   :  { %s223_s28 = vpop.sfrf %222 }
  0x8e   :  { %p348_p10 = scmp.ne.s32.totalorder %s223_s28, 0 }
  0x90   :  { %227 = shalt.err (%p348_p10)  }
  0x91   :  { %229 = vsyncmov [#allocation3 + $0x2] }
  0x94   :  { %s230_s6 = vpop.sfrf %229 }
  0x95   :  { %p349_p11 = scmp.ne.s32.totalorder %s230_s6, 0 }
  0x97   :  { %234 = shalt.err (%p349_p11)  }
  0x98   :  { %236 = vsyncmov [#allocation3 + $0x3] }
  0x9b   :  { %s237_s29 = vpop.sfrf %236 }
  0x9c   :  { %p350_p12 = scmp.ne.s32.totalorder %s237_s29, 0 }
  0x9e   :  { %241 = shalt.err (%p350_p12)  }
  0x9f   :  { %243 = vsyncmov [#allocation3 + $0x4] }
  0xa2   :  { %s244_s21 = vpop.sfrf %243 }
  0xa3   :  { %p351_p0 = scmp.ne.s32.totalorder %s244_s21, 0 }
  0xa5   :  { %248 = shalt.err (%p351_p0)  }
  0xa6   :  { %250 = vsyncmov [#allocation3 + $0x5] }
  0xa9   :  { %s251_s1 = vpop.sfrf %250 }
  0xaa   :  { %p352_p1 = scmp.ne.s32.totalorder %s251_s1, 0 }
  0xac   :  { %255 = shalt.err (%p352_p1)  }
  0xad   :  { %257 = vsyncmov [#allocation3 + $0x6] }
  0xb0   :  { %s258_s2 = vpop.sfrf %257 }
  0xb1   :  { %p353_p2 = scmp.ne.s32.totalorder %s258_s2, 0 }
  0xb3   :  { %262 = shalt.err (%p353_p2)  }
  0xb4   :  { %264 = vsyncmov [#allocation3 + $0x7] }
  0xb7   :  { %s265_s3 = vpop.sfrf %264 }
  0xb8   :  { %p354_p13 = scmp.ne.s32.totalorder %s265_s3, 0 }
  0xba   :  { %269 = shalt.err (%p354_p13)  }

</bundles_post_ra>
